<compile_context>
chip_gen: v6e
topology: v6e:2x2x1
jax: 0.10.0
libtpu: 0.0.40
codegen_flags: <defaults>
</compile_context>

<pallas_src>
import jax
import jax.numpy as jnp
import numpy as np
from jax import lax
from jax.experimental import pallas as pl
from jax.experimental.pallas import tpu as pltpu

HEADS = 4
ALPHA = 0.01          # LeakyReLU negative slope
NEG_FILL = -9.0e15    # mask fill value (matches the PyTorch module)


def _elu(v):
    # ELU(alpha=1): v if v > 0 else exp(v) - 1 ; clamp exp arg so the unselected branch never overflows.
    return jnp.where(v > 0.0, v, jnp.exp(jnp.minimum(v, 0.0)) - 1.0)


def _attention(Wh, a1, a2, adj_pos):
    """Masked GAT attention for one layer.

    Wh: (N, D)   a1, a2: (1, D)   adj_pos: (N, N) bool
    returns softmax_row( leakyrelu(Wh@a1 + (Wh@a2)^T) masked by adj ) : (N, N)
    """
    Wh1 = jnp.sum(Wh * a1, axis=-1, keepdims=True)                       # (N, 1)  VPU
    # (1, N) row without an explicit transpose: contract the feature axis of both operands.
    Wh2 = lax.dot_general(a2, Wh, (((1,), (1,)), ((), ())),
                          preferred_element_type=jnp.float32)            # (1, N)
    e = Wh1 + Wh2                                                        # (N, N)
    e = jnp.where(e > 0.0, e, ALPHA * e)                                 # LeakyReLU
    att = jnp.where(adj_pos, e, NEG_FILL)
    m = jnp.max(att, axis=1, keepdims=True)                              # stable softmax
    p = jnp.exp(att - m)
    denom = jnp.sum(p, axis=1, keepdims=True)
    return p * pl.reciprocal(denom, approx=True)                         # EUP reciprocal


def _multihead_gat_kernel(x_ref, adj_ref, Wh_ref, a1h_ref, a2h_ref,
                          Wo_ref, a1o_ref, a2o_ref, o_ref):
    x = x_ref[...].astype(jnp.float32)           # (N, Fin)
    adj_pos = adj_ref[...] > 0.0                 # (N, N) bool — computed once, reused 5x
    Wheads = Wh_ref[...].astype(jnp.float32)     # (H, Fin, nhid)
    a1h = a1h_ref[...].astype(jnp.float32)       # (H, nhid)
    a2h = a2h_ref[...].astype(jnp.float32)       # (H, nhid)
    Wo = Wo_ref[...].astype(jnp.float32)         # (H, nhid, Fout)  (= W_out split per head)
    a1o = a1o_ref[...].astype(jnp.float32)       # (1, Fout)
    a2o = a2o_ref[...].astype(jnp.float32)       # (1, Fout)

    # TODO(synk): training-mode dropout (RNG masking) not implemented; eval-mode identity.

    # ---- 4 attention heads, fused directly with the output-layer projection ----------
    # concat(head_0..head_3) @ W_out == sum_h head_h @ W_out[h]  ->  the lane-direction
    # concatenate is never materialized; each head accumulates one small MXU matmul.
    WhO = jnp.zeros((x.shape[0], Wo.shape[2]), dtype=jnp.float32)        # (N, Fout)
    for h in range(HEADS):                                               # static unroll
        Wh = jnp.dot(x, Wheads[h], preferred_element_type=jnp.float32)   # (N, nhid)  MXU
        att = _attention(Wh, a1h[h:h + 1, :], a2h[h:h + 1, :], adj_pos)  # (N, N)
        head_out = _elu(jnp.dot(att, Wh, preferred_element_type=jnp.float32))  # (N, nhid)
        WhO = WhO + jnp.dot(head_out, Wo[h], preferred_element_type=jnp.float32)

    # ---- output GAT layer (concat=False) + final ELU ----------------------------------
    att_o = _attention(WhO, a1o, a2o, adj_pos)                           # (N, N)
    hp = jnp.dot(att_o, WhO, preferred_element_type=jnp.float32)         # (N, Fout)
    o_ref[...] = _elu(hp).astype(o_ref.dtype)


def multihead_gat_forward(x, adj, W_heads, a1_heads, a2_heads, W_out, a1_out, a2_out):
    N, Fin = x.shape
    H, Fin2, nhid = W_heads.shape
    assert H == HEADS and Fin2 == Fin
    assert adj.shape == (N, N)
    assert W_out.shape[0] == H * nhid
    Fout = W_out.shape[1]
    # Split W_out into per-head slabs so the kernel indexes along the (cheap) leading axis.
    Wo3 = W_out.reshape(H, nhid, Fout)
    vmem = pl.BlockSpec(memory_space=pltpu.MemorySpace.VMEM)
    # Single launch, no grid: every operand is a whole-array VMEM block (total < 100 KiB).
    return pl.pallas_call(
        _multihead_gat_kernel,
        out_shape=jax.ShapeDtypeStruct((N, Fout), x.dtype),
        in_specs=[vmem] * 8,
        out_specs=vmem,
    )(x, adj, W_heads, a1_heads, a2_heads, Wo3, a1_out, a2_out)


# ---------------------------------------------------------------------------
# Pure-JAX reference (mirrors the PyTorch forward in eval mode)
# ---------------------------------------------------------------------------
def _reference(x, adj, W_heads, a1_heads, a2_heads, W_out, a1_out, a2_out):
    def layer(h, W, a1, a2, concat):
        Wh = h @ W
        Wh1 = Wh @ a1.reshape(-1, 1)
        Wh2 = Wh @ a2.reshape(-1, 1)
        e = jax.nn.leaky_relu(Wh1 + Wh2.T, negative_slope=ALPHA)
        att = jnp.where(adj > 0, e, NEG_FILL)
        att = jax.nn.softmax(att, axis=1)
        hp = att @ Wh
        return jax.nn.elu(hp) if concat else hp

    outs = [layer(x, W_heads[i], a1_heads[i], a2_heads[i], True) for i in range(HEADS)]
    xcat = jnp.concatenate(outs, axis=1)
    return jax.nn.elu(layer(xcat, W_out, a1_out[0], a2_out[0], False))


if __name__ == "__main__":
    # MultiHeadGAT(in_features=32, nhid=32, out_features=32, heads=4) on a 16-node graph.
    N, Fin, nhid, Fout = 16, 32, 32, 32

    key = jax.random.PRNGKey(0)
    ks = jax.random.split(key, 6)
    x = jax.random.normal(ks[0], (N, Fin), dtype=jnp.float32)
    adj = (jax.random.uniform(ks[1], (N, N)) < 0.4).astype(jnp.float32)
    adj = jnp.maximum(adj, jnp.eye(N, dtype=jnp.float32))   # self loops -> no fully-masked rows

    def xavier(k, shape, gain=1.414):
        fan_in, fan_out = shape[-2], shape[-1]
        bound = gain * (6.0 / (fan_in + fan_out)) ** 0.5
        return jax.random.uniform(k, shape, jnp.float32, -bound, bound)

    W_heads = xavier(ks[2], (HEADS, Fin, nhid))             # per-head W
    a_heads = xavier(ks[3], (HEADS, 2 * nhid, 1))           # per-head a
    a1_heads = a_heads[:, :nhid, 0]                         # (H, nhid)
    a2_heads = a_heads[:, nhid:, 0]                         # (H, nhid)
    W_out = xavier(ks[4], (nhid * HEADS, Fout))             # output-layer W
    a_out = xavier(ks[5], (2 * Fout, 1))                    # output-layer a
    a1_out = a_out[:Fout, 0][None, :]                       # (1, Fout)
    a2_out = a_out[Fout:, 0][None, :]                       # (1, Fout)

    out = jax.block_until_ready(
        multihead_gat_forward(x, adj, W_heads, a1_heads, a2_heads, W_out, a1_out, a2_out))
    ref = jax.block_until_ready(
        _reference(x, adj, W_heads, a1_heads, a2_heads, W_out, a1_out, a2_out))

    np.testing.assert_allclose(np.asarray(out), np.asarray(ref), rtol=2e-2, atol=2e-2)
    print("KERNEL_OK")
</pallas_src>

<mosaic_0001>
module attributes {stable_mosaic.version = 11 : i64} {
  func.func @_multihead_gat_kernel(%arg0: memref<16x32xf32, #tpu.memory_space<vmem>>, %arg1: memref<16x16xf32, #tpu.memory_space<vmem>>, %arg2: memref<4x32x32xf32, #tpu.memory_space<vmem>>, %arg3: memref<4x32xf32, #tpu.memory_space<vmem>>, %arg4: memref<4x32xf32, #tpu.memory_space<vmem>>, %arg5: memref<4x32x32xf32, #tpu.memory_space<vmem>>, %arg6: memref<1x32xf32, #tpu.memory_space<vmem>>, %arg7: memref<1x32xf32, #tpu.memory_space<vmem>>, %arg8: memref<16x32xf32, #tpu.memory_space<vmem>>) attributes {dimension_semantics = [], scalar_prefetch = 0 : i64, scratch_operands = 0 : i64, tpu.core_type = #tpu.core_type<tc>} {
    %c0 = arith.constant 0 : index
    %c0_0 = arith.constant 0 : index
    %0 = vector.load %arg0[%c0, %c0_0] : memref<16x32xf32, #tpu.memory_space<vmem>>, vector<16x32xf32>
    %c0_1 = arith.constant 0 : index
    %c0_2 = arith.constant 0 : index
    %1 = vector.load %arg1[%c0_1, %c0_2] : memref<16x16xf32, #tpu.memory_space<vmem>>, vector<16x16xf32>
    %cst = arith.constant 0.000000e+00 : f32
    %2 = vector.broadcast %cst : f32 to vector<16x16xf32>
    %3 = arith.cmpf ogt, %1, %2 : vector<16x16xf32>
    %c0_3 = arith.constant 0 : index
    %c0_4 = arith.constant 0 : index
    %c0_5 = arith.constant 0 : index
    %4 = vector.load %arg2[%c0_3, %c0_4, %c0_5] : memref<4x32x32xf32, #tpu.memory_space<vmem>>, vector<4x32x32xf32>
    %c0_6 = arith.constant 0 : index
    %c0_7 = arith.constant 0 : index
    %5 = vector.load %arg3[%c0_6, %c0_7] : memref<4x32xf32, #tpu.memory_space<vmem>>, vector<4x32xf32>
    %c0_8 = arith.constant 0 : index
    %c0_9 = arith.constant 0 : index
    %6 = vector.load %arg4[%c0_8, %c0_9] : memref<4x32xf32, #tpu.memory_space<vmem>>, vector<4x32xf32>
    %c0_10 = arith.constant 0 : index
    %c0_11 = arith.constant 0 : index
    %c0_12 = arith.constant 0 : index
    %7 = vector.load %arg5[%c0_10, %c0_11, %c0_12] : memref<4x32x32xf32, #tpu.memory_space<vmem>>, vector<4x32x32xf32>
    %c0_13 = arith.constant 0 : index
    %c0_14 = arith.constant 0 : index
    %8 = vector.load %arg6[%c0_13, %c0_14] : memref<1x32xf32, #tpu.memory_space<vmem>>, vector<1x32xf32>
    %c0_15 = arith.constant 0 : index
    %c0_16 = arith.constant 0 : index
    %9 = vector.load %arg7[%c0_15, %c0_16] : memref<1x32xf32, #tpu.memory_space<vmem>>, vector<1x32xf32>
    %cst_17 = arith.constant 0.000000e+00 : f32
    %10 = vector.broadcast %cst_17 : f32 to vector<16x32xf32>
    %11 = vector.extract_strided_slice %4 {offsets = [0, 0, 0], sizes = [1, 32, 32], strides = [1, 1, 1]} : vector<4x32x32xf32> to vector<1x32x32xf32>
    %12 = vector.shape_cast %11 : vector<1x32x32xf32> to vector<32x32xf32>
    %cst_18 = arith.constant dense<0.000000e+00> : vector<16x32xf32>
    %13 = tpu.matmul %0, %12, %cst_18 {dimension_numbers = #tpu.dot_dimension_numbers<[1], [0], [0], [1], [0, 0, 1, 1], [], []>} : vector<16x32xf32>, vector<32x32xf32>, vector<16x32xf32> -> vector<16x32xf32>
    %14 = vector.extract_strided_slice %5 {offsets = [0, 0], sizes = [1, 32], strides = [1, 1]} : vector<4x32xf32> to vector<1x32xf32>
    %15 = vector.extract_strided_slice %6 {offsets = [0, 0], sizes = [1, 32], strides = [1, 1]} : vector<4x32xf32> to vector<1x32xf32>
    %16 = vector.broadcast %14 : vector<1x32xf32> to vector<16x32xf32>
    %17 = arith.mulf %13, %16 : vector<16x32xf32>
    %cst_19 = arith.constant dense<0.000000e+00> : vector<16xf32>
    %18 = vector.multi_reduction <add>, %17, %cst_19 [1] : vector<16x32xf32> to vector<16xf32>
    %19 = vector.shape_cast %18 : vector<16xf32> to vector<16x1xf32>
    %cst_20 = arith.constant dense<0.000000e+00> : vector<1x16xf32>
    %20 = tpu.matmul %15, %13, %cst_20 {dimension_numbers = #tpu.dot_dimension_numbers<[1], [1], [0], [0], [0, 0, 1, 0], [], []>} : vector<1x32xf32>, vector<16x32xf32>, vector<1x16xf32> -> vector<1x16xf32>
    %21 = vector.broadcast %19 : vector<16x1xf32> to vector<16x16xf32>
    %22 = vector.broadcast %20 : vector<1x16xf32> to vector<16x16xf32>
    %23 = arith.addf %21, %22 : vector<16x16xf32>
    %cst_21 = arith.constant 0.000000e+00 : f32
    %24 = vector.broadcast %cst_21 : f32 to vector<16x16xf32>
    %25 = arith.cmpf ogt, %23, %24 : vector<16x16xf32>
    %cst_22 = arith.constant 0.00999999977 : f32
    %26 = vector.broadcast %cst_22 : f32 to vector<16x16xf32>
    %27 = arith.mulf %26, %23 : vector<16x16xf32>
    %28 = arith.select %25, %23, %27 : vector<16x16xi1>, vector<16x16xf32>
    %cst_23 = arith.constant -9.000000e+15 : f32
    %29 = vector.broadcast %cst_23 : f32 to vector<16x16xf32>
    %30 = arith.select %3, %28, %29 : vector<16x16xi1>, vector<16x16xf32>
    %cst_24 = arith.constant dense<0xFF800000> : vector<16xf32>
    %31 = vector.multi_reduction <maximumf>, %30, %cst_24 [1] : vector<16x16xf32> to vector<16xf32>
    %32 = vector.shape_cast %31 : vector<16xf32> to vector<16x1xf32>
    %33 = vector.broadcast %32 : vector<16x1xf32> to vector<16x16xf32>
    %34 = arith.subf %30, %33 : vector<16x16xf32>
    %35 = math.exp %34 : vector<16x16xf32>
    %cst_25 = arith.constant dense<0.000000e+00> : vector<16xf32>
    %36 = vector.multi_reduction <add>, %35, %cst_25 [1] : vector<16x16xf32> to vector<16xf32>
    %37 = vector.shape_cast %36 : vector<16xf32> to vector<16x1xf32>
    %38 = tpu.reciprocal %37 {approx = true} : vector<16x1xf32> -> vector<16x1xf32>
    %39 = vector.broadcast %38 : vector<16x1xf32> to vector<16x16xf32>
    %40 = arith.mulf %35, %39 : vector<16x16xf32>
    %cst_26 = arith.constant dense<0.000000e+00> : vector<16x32xf32>
    %41 = tpu.matmul %40, %13, %cst_26 {dimension_numbers = #tpu.dot_dimension_numbers<[1], [0], [0], [1], [0, 0, 1, 1], [], []>} : vector<16x16xf32>, vector<16x32xf32>, vector<16x32xf32> -> vector<16x32xf32>
    %cst_27 = arith.constant 0.000000e+00 : f32
    %42 = vector.broadcast %cst_27 : f32 to vector<16x32xf32>
    %43 = arith.cmpf ogt, %41, %42 : vector<16x32xf32>
    %cst_28 = arith.constant 0.000000e+00 : f32
    %44 = vector.broadcast %cst_28 : f32 to vector<16x32xf32>
    %45 = arith.minimumf %41, %44 : vector<16x32xf32>
    %46 = math.exp %45 : vector<16x32xf32>
    %cst_29 = arith.constant 1.000000e+00 : f32
    %47 = vector.broadcast %cst_29 : f32 to vector<16x32xf32>
    %48 = arith.subf %46, %47 : vector<16x32xf32>
    %49 = arith.select %43, %41, %48 : vector<16x32xi1>, vector<16x32xf32>
    %50 = vector.extract_strided_slice %7 {offsets = [0, 0, 0], sizes = [1, 32, 32], strides = [1, 1, 1]} : vector<4x32x32xf32> to vector<1x32x32xf32>
    %51 = vector.shape_cast %50 : vector<1x32x32xf32> to vector<32x32xf32>
    %cst_30 = arith.constant dense<0.000000e+00> : vector<16x32xf32>
    %52 = tpu.matmul %49, %51, %cst_30 {dimension_numbers = #tpu.dot_dimension_numbers<[1], [0], [0], [1], [0, 0, 1, 1], [], []>} : vector<16x32xf32>, vector<32x32xf32>, vector<16x32xf32> -> vector<16x32xf32>
    %53 = arith.addf %10, %52 : vector<16x32xf32>
    %54 = vector.extract_strided_slice %4 {offsets = [1, 0, 0], sizes = [1, 32, 32], strides = [1, 1, 1]} : vector<4x32x32xf32> to vector<1x32x32xf32>
    %55 = vector.shape_cast %54 : vector<1x32x32xf32> to vector<32x32xf32>
    %cst_31 = arith.constant dense<0.000000e+00> : vector<16x32xf32>
    %56 = tpu.matmul %0, %55, %cst_31 {dimension_numbers = #tpu.dot_dimension_numbers<[1], [0], [0], [1], [0, 0, 1, 1], [], []>} : vector<16x32xf32>, vector<32x32xf32>, vector<16x32xf32> -> vector<16x32xf32>
    %57 = vector.extract_strided_slice %5 {offsets = [1, 0], sizes = [1, 32], strides = [1, 1]} : vector<4x32xf32> to vector<1x32xf32>
    %58 = vector.extract_strided_slice %6 {offsets = [1, 0], sizes = [1, 32], strides = [1, 1]} : vector<4x32xf32> to vector<1x32xf32>
    %59 = vector.broadcast %57 : vector<1x32xf32> to vector<16x32xf32>
    %60 = arith.mulf %56, %59 : vector<16x32xf32>
    %cst_32 = arith.constant dense<0.000000e+00> : vector<16xf32>
    %61 = vector.multi_reduction <add>, %60, %cst_32 [1] : vector<16x32xf32> to vector<16xf32>
    %62 = vector.shape_cast %61 : vector<16xf32> to vector<16x1xf32>
    %cst_33 = arith.constant dense<0.000000e+00> : vector<1x16xf32>
    %63 = tpu.matmul %58, %56, %cst_33 {dimension_numbers = #tpu.dot_dimension_numbers<[1], [1], [0], [0], [0, 0, 1, 0], [], []>} : vector<1x32xf32>, vector<16x32xf32>, vector<1x16xf32> -> vector<1x16xf32>
    %64 = vector.broadcast %62 : vector<16x1xf32> to vector<16x16xf32>
    %65 = vector.broadcast %63 : vector<1x16xf32> to vector<16x16xf32>
    %66 = arith.addf %64, %65 : vector<16x16xf32>
    %cst_34 = arith.constant 0.000000e+00 : f32
    %67 = vector.broadcast %cst_34 : f32 to vector<16x16xf32>
    %68 = arith.cmpf ogt, %66, %67 : vector<16x16xf32>
    %cst_35 = arith.constant 0.00999999977 : f32
    %69 = vector.broadcast %cst_35 : f32 to vector<16x16xf32>
    %70 = arith.mulf %69, %66 : vector<16x16xf32>
    %71 = arith.select %68, %66, %70 : vector<16x16xi1>, vector<16x16xf32>
    %cst_36 = arith.constant -9.000000e+15 : f32
    %72 = vector.broadcast %cst_36 : f32 to vector<16x16xf32>
    %73 = arith.select %3, %71, %72 : vector<16x16xi1>, vector<16x16xf32>
    %cst_37 = arith.constant dense<0xFF800000> : vector<16xf32>
    %74 = vector.multi_reduction <maximumf>, %73, %cst_37 [1] : vector<16x16xf32> to vector<16xf32>
    %75 = vector.shape_cast %74 : vector<16xf32> to vector<16x1xf32>
    %76 = vector.broadcast %75 : vector<16x1xf32> to vector<16x16xf32>
    %77 = arith.subf %73, %76 : vector<16x16xf32>
    %78 = math.exp %77 : vector<16x16xf32>
    %cst_38 = arith.constant dense<0.000000e+00> : vector<16xf32>
    %79 = vector.multi_reduction <add>, %78, %cst_38 [1] : vector<16x16xf32> to vector<16xf32>
    %80 = vector.shape_cast %79 : vector<16xf32> to vector<16x1xf32>
    %81 = tpu.reciprocal %80 {approx = true} : vector<16x1xf32> -> vector<16x1xf32>
    %82 = vector.broadcast %81 : vector<16x1xf32> to vector<16x16xf32>
    %83 = arith.mulf %78, %82 : vector<16x16xf32>
    %cst_39 = arith.constant dense<0.000000e+00> : vector<16x32xf32>
    %84 = tpu.matmul %83, %56, %cst_39 {dimension_numbers = #tpu.dot_dimension_numbers<[1], [0], [0], [1], [0, 0, 1, 1], [], []>} : vector<16x16xf32>, vector<16x32xf32>, vector<16x32xf32> -> vector<16x32xf32>
    %cst_40 = arith.constant 0.000000e+00 : f32
    %85 = vector.broadcast %cst_40 : f32 to vector<16x32xf32>
    %86 = arith.cmpf ogt, %84, %85 : vector<16x32xf32>
    %cst_41 = arith.constant 0.000000e+00 : f32
    %87 = vector.broadcast %cst_41 : f32 to vector<16x32xf32>
    %88 = arith.minimumf %84, %87 : vector<16x32xf32>
    %89 = math.exp %88 : vector<16x32xf32>
    %cst_42 = arith.constant 1.000000e+00 : f32
    %90 = vector.broadcast %cst_42 : f32 to vector<16x32xf32>
    %91 = arith.subf %89, %90 : vector<16x32xf32>
    %92 = arith.select %86, %84, %91 : vector<16x32xi1>, vector<16x32xf32>
    %93 = vector.extract_strided_slice %7 {offsets = [1, 0, 0], sizes = [1, 32, 32], strides = [1, 1, 1]} : vector<4x32x32xf32> to vector<1x32x32xf32>
    %94 = vector.shape_cast %93 : vector<1x32x32xf32> to vector<32x32xf32>
    %cst_43 = arith.constant dense<0.000000e+00> : vector<16x32xf32>
    %95 = tpu.matmul %92, %94, %cst_43 {dimension_numbers = #tpu.dot_dimension_numbers<[1], [0], [0], [1], [0, 0, 1, 1], [], []>} : vector<16x32xf32>, vector<32x32xf32>, vector<16x32xf32> -> vector<16x32xf32>
    %96 = arith.addf %53, %95 : vector<16x32xf32>
    %97 = vector.extract_strided_slice %4 {offsets = [2, 0, 0], sizes = [1, 32, 32], strides = [1, 1, 1]} : vector<4x32x32xf32> to vector<1x32x32xf32>
    %98 = vector.shape_cast %97 : vector<1x32x32xf32> to vector<32x32xf32>
    %cst_44 = arith.constant dense<0.000000e+00> : vector<16x32xf32>
    %99 = tpu.matmul %0, %98, %cst_44 {dimension_numbers = #tpu.dot_dimension_numbers<[1], [0], [0], [1], [0, 0, 1, 1], [], []>} : vector<16x32xf32>, vector<32x32xf32>, vector<16x32xf32> -> vector<16x32xf32>
    %100 = vector.extract_strided_slice %5 {offsets = [2, 0], sizes = [1, 32], strides = [1, 1]} : vector<4x32xf32> to vector<1x32xf32>
    %101 = vector.extract_strided_slice %6 {offsets = [2, 0], sizes = [1, 32], strides = [1, 1]} : vector<4x32xf32> to vector<1x32xf32>
    %102 = vector.broadcast %100 : vector<1x32xf32> to vector<16x32xf32>
    %103 = arith.mulf %99, %102 : vector<16x32xf32>
    %cst_45 = arith.constant dense<0.000000e+00> : vector<16xf32>
    %104 = vector.multi_reduction <add>, %103, %cst_45 [1] : vector<16x32xf32> to vector<16xf32>
    %105 = vector.shape_cast %104 : vector<16xf32> to vector<16x1xf32>
    %cst_46 = arith.constant dense<0.000000e+00> : vector<1x16xf32>
    %106 = tpu.matmul %101, %99, %cst_46 {dimension_numbers = #tpu.dot_dimension_numbers<[1], [1], [0], [0], [0, 0, 1, 0], [], []>} : vector<1x32xf32>, vector<16x32xf32>, vector<1x16xf32> -> vector<1x16xf32>
    %107 = vector.broadcast %105 : vector<16x1xf32> to vector<16x16xf32>
    %108 = vector.broadcast %106 : vector<1x16xf32> to vector<16x16xf32>
    %109 = arith.addf %107, %108 : vector<16x16xf32>
    %cst_47 = arith.constant 0.000000e+00 : f32
    %110 = vector.broadcast %cst_47 : f32 to vector<16x16xf32>
    %111 = arith.cmpf ogt, %109, %110 : vector<16x16xf32>
    %cst_48 = arith.constant 0.00999999977 : f32
    %112 = vector.broadcast %cst_48 : f32 to vector<16x16xf32>
    %113 = arith.mulf %112, %109 : vector<16x16xf32>
    %114 = arith.select %111, %109, %113 : vector<16x16xi1>, vector<16x16xf32>
    %cst_49 = arith.constant -9.000000e+15 : f32
    %115 = vector.broadcast %cst_49 : f32 to vector<16x16xf32>
    %116 = arith.select %3, %114, %115 : vector<16x16xi1>, vector<16x16xf32>
    %cst_50 = arith.constant dense<0xFF800000> : vector<16xf32>
    %117 = vector.multi_reduction <maximumf>, %116, %cst_50 [1] : vector<16x16xf32> to vector<16xf32>
    %118 = vector.shape_cast %117 : vector<16xf32> to vector<16x1xf32>
    %119 = vector.broadcast %118 : vector<16x1xf32> to vector<16x16xf32>
    %120 = arith.subf %116, %119 : vector<16x16xf32>
    %121 = math.exp %120 : vector<16x16xf32>
    %cst_51 = arith.constant dense<0.000000e+00> : vector<16xf32>
    %122 = vector.multi_reduction <add>, %121, %cst_51 [1] : vector<16x16xf32> to vector<16xf32>
    %123 = vector.shape_cast %122 : vector<16xf32> to vector<16x1xf32>
    %124 = tpu.reciprocal %123 {approx = true} : vector<16x1xf32> -> vector<16x1xf32>
    %125 = vector.broadcast %124 : vector<16x1xf32> to vector<16x16xf32>
    %126 = arith.mulf %121, %125 : vector<16x16xf32>
    %cst_52 = arith.constant dense<0.000000e+00> : vector<16x32xf32>
    %127 = tpu.matmul %126, %99, %cst_52 {dimension_numbers = #tpu.dot_dimension_numbers<[1], [0], [0], [1], [0, 0, 1, 1], [], []>} : vector<16x16xf32>, vector<16x32xf32>, vector<16x32xf32> -> vector<16x32xf32>
    %cst_53 = arith.constant 0.000000e+00 : f32
    %128 = vector.broadcast %cst_53 : f32 to vector<16x32xf32>
    %129 = arith.cmpf ogt, %127, %128 : vector<16x32xf32>
    %cst_54 = arith.constant 0.000000e+00 : f32
    %130 = vector.broadcast %cst_54 : f32 to vector<16x32xf32>
    %131 = arith.minimumf %127, %130 : vector<16x32xf32>
    %132 = math.exp %131 : vector<16x32xf32>
    %cst_55 = arith.constant 1.000000e+00 : f32
    %133 = vector.broadcast %cst_55 : f32 to vector<16x32xf32>
    %134 = arith.subf %132, %133 : vector<16x32xf32>
    %135 = arith.select %129, %127, %134 : vector<16x32xi1>, vector<16x32xf32>
    %136 = vector.extract_strided_slice %7 {offsets = [2, 0, 0], sizes = [1, 32, 32], strides = [1, 1, 1]} : vector<4x32x32xf32> to vector<1x32x32xf32>
    %137 = vector.shape_cast %136 : vector<1x32x32xf32> to vector<32x32xf32>
    %cst_56 = arith.constant dense<0.000000e+00> : vector<16x32xf32>
    %138 = tpu.matmul %135, %137, %cst_56 {dimension_numbers = #tpu.dot_dimension_numbers<[1], [0], [0], [1], [0, 0, 1, 1], [], []>} : vector<16x32xf32>, vector<32x32xf32>, vector<16x32xf32> -> vector<16x32xf32>
    %139 = arith.addf %96, %138 : vector<16x32xf32>
    %140 = vector.extract_strided_slice %4 {offsets = [3, 0, 0], sizes = [1, 32, 32], strides = [1, 1, 1]} : vector<4x32x32xf32> to vector<1x32x32xf32>
    %141 = vector.shape_cast %140 : vector<1x32x32xf32> to vector<32x32xf32>
    %cst_57 = arith.constant dense<0.000000e+00> : vector<16x32xf32>
    %142 = tpu.matmul %0, %141, %cst_57 {dimension_numbers = #tpu.dot_dimension_numbers<[1], [0], [0], [1], [0, 0, 1, 1], [], []>} : vector<16x32xf32>, vector<32x32xf32>, vector<16x32xf32> -> vector<16x32xf32>
    %143 = vector.extract_strided_slice %5 {offsets = [3, 0], sizes = [1, 32], strides = [1, 1]} : vector<4x32xf32> to vector<1x32xf32>
    %144 = vector.extract_strided_slice %6 {offsets = [3, 0], sizes = [1, 32], strides = [1, 1]} : vector<4x32xf32> to vector<1x32xf32>
    %145 = vector.broadcast %143 : vector<1x32xf32> to vector<16x32xf32>
    %146 = arith.mulf %142, %145 : vector<16x32xf32>
    %cst_58 = arith.constant dense<0.000000e+00> : vector<16xf32>
    %147 = vector.multi_reduction <add>, %146, %cst_58 [1] : vector<16x32xf32> to vector<16xf32>
    %148 = vector.shape_cast %147 : vector<16xf32> to vector<16x1xf32>
    %cst_59 = arith.constant dense<0.000000e+00> : vector<1x16xf32>
    %149 = tpu.matmul %144, %142, %cst_59 {dimension_numbers = #tpu.dot_dimension_numbers<[1], [1], [0], [0], [0, 0, 1, 0], [], []>} : vector<1x32xf32>, vector<16x32xf32>, vector<1x16xf32> -> vector<1x16xf32>
    %150 = vector.broadcast %148 : vector<16x1xf32> to vector<16x16xf32>
    %151 = vector.broadcast %149 : vector<1x16xf32> to vector<16x16xf32>
    %152 = arith.addf %150, %151 : vector<16x16xf32>
    %cst_60 = arith.constant 0.000000e+00 : f32
    %153 = vector.broadcast %cst_60 : f32 to vector<16x16xf32>
    %154 = arith.cmpf ogt, %152, %153 : vector<16x16xf32>
    %cst_61 = arith.constant 0.00999999977 : f32
    %155 = vector.broadcast %cst_61 : f32 to vector<16x16xf32>
    %156 = arith.mulf %155, %152 : vector<16x16xf32>
    %157 = arith.select %154, %152, %156 : vector<16x16xi1>, vector<16x16xf32>
    %cst_62 = arith.constant -9.000000e+15 : f32
    %158 = vector.broadcast %cst_62 : f32 to vector<16x16xf32>
    %159 = arith.select %3, %157, %158 : vector<16x16xi1>, vector<16x16xf32>
    %cst_63 = arith.constant dense<0xFF800000> : vector<16xf32>
    %160 = vector.multi_reduction <maximumf>, %159, %cst_63 [1] : vector<16x16xf32> to vector<16xf32>
    %161 = vector.shape_cast %160 : vector<16xf32> to vector<16x1xf32>
    %162 = vector.broadcast %161 : vector<16x1xf32> to vector<16x16xf32>
    %163 = arith.subf %159, %162 : vector<16x16xf32>
    %164 = math.exp %163 : vector<16x16xf32>
    %cst_64 = arith.constant dense<0.000000e+00> : vector<16xf32>
    %165 = vector.multi_reduction <add>, %164, %cst_64 [1] : vector<16x16xf32> to vector<16xf32>
    %166 = vector.shape_cast %165 : vector<16xf32> to vector<16x1xf32>
    %167 = tpu.reciprocal %166 {approx = true} : vector<16x1xf32> -> vector<16x1xf32>
    %168 = vector.broadcast %167 : vector<16x1xf32> to vector<16x16xf32>
    %169 = arith.mulf %164, %168 : vector<16x16xf32>
    %cst_65 = arith.constant dense<0.000000e+00> : vector<16x32xf32>
    %170 = tpu.matmul %169, %142, %cst_65 {dimension_numbers = #tpu.dot_dimension_numbers<[1], [0], [0], [1], [0, 0, 1, 1], [], []>} : vector<16x16xf32>, vector<16x32xf32>, vector<16x32xf32> -> vector<16x32xf32>
    %cst_66 = arith.constant 0.000000e+00 : f32
    %171 = vector.broadcast %cst_66 : f32 to vector<16x32xf32>
    %172 = arith.cmpf ogt, %170, %171 : vector<16x32xf32>
    %cst_67 = arith.constant 0.000000e+00 : f32
    %173 = vector.broadcast %cst_67 : f32 to vector<16x32xf32>
    %174 = arith.minimumf %170, %173 : vector<16x32xf32>
    %175 = math.exp %174 : vector<16x32xf32>
    %cst_68 = arith.constant 1.000000e+00 : f32
    %176 = vector.broadcast %cst_68 : f32 to vector<16x32xf32>
    %177 = arith.subf %175, %176 : vector<16x32xf32>
    %178 = arith.select %172, %170, %177 : vector<16x32xi1>, vector<16x32xf32>
    %179 = vector.extract_strided_slice %7 {offsets = [3, 0, 0], sizes = [1, 32, 32], strides = [1, 1, 1]} : vector<4x32x32xf32> to vector<1x32x32xf32>
    %180 = vector.shape_cast %179 : vector<1x32x32xf32> to vector<32x32xf32>
    %cst_69 = arith.constant dense<0.000000e+00> : vector<16x32xf32>
    %181 = tpu.matmul %178, %180, %cst_69 {dimension_numbers = #tpu.dot_dimension_numbers<[1], [0], [0], [1], [0, 0, 1, 1], [], []>} : vector<16x32xf32>, vector<32x32xf32>, vector<16x32xf32> -> vector<16x32xf32>
    %182 = arith.addf %139, %181 : vector<16x32xf32>
    %183 = vector.broadcast %8 : vector<1x32xf32> to vector<16x32xf32>
    %184 = arith.mulf %182, %183 : vector<16x32xf32>
    %cst_70 = arith.constant dense<0.000000e+00> : vector<16xf32>
    %185 = vector.multi_reduction <add>, %184, %cst_70 [1] : vector<16x32xf32> to vector<16xf32>
    %186 = vector.shape_cast %185 : vector<16xf32> to vector<16x1xf32>
    %cst_71 = arith.constant dense<0.000000e+00> : vector<1x16xf32>
    %187 = tpu.matmul %9, %182, %cst_71 {dimension_numbers = #tpu.dot_dimension_numbers<[1], [1], [0], [0], [0, 0, 1, 0], [], []>} : vector<1x32xf32>, vector<16x32xf32>, vector<1x16xf32> -> vector<1x16xf32>
    %188 = vector.broadcast %186 : vector<16x1xf32> to vector<16x16xf32>
    %189 = vector.broadcast %187 : vector<1x16xf32> to vector<16x16xf32>
    %190 = arith.addf %188, %189 : vector<16x16xf32>
    %cst_72 = arith.constant 0.000000e+00 : f32
    %191 = vector.broadcast %cst_72 : f32 to vector<16x16xf32>
    %192 = arith.cmpf ogt, %190, %191 : vector<16x16xf32>
    %cst_73 = arith.constant 0.00999999977 : f32
    %193 = vector.broadcast %cst_73 : f32 to vector<16x16xf32>
    %194 = arith.mulf %193, %190 : vector<16x16xf32>
    %195 = arith.select %192, %190, %194 : vector<16x16xi1>, vector<16x16xf32>
    %cst_74 = arith.constant -9.000000e+15 : f32
    %196 = vector.broadcast %cst_74 : f32 to vector<16x16xf32>
    %197 = arith.select %3, %195, %196 : vector<16x16xi1>, vector<16x16xf32>
    %cst_75 = arith.constant dense<0xFF800000> : vector<16xf32>
    %198 = vector.multi_reduction <maximumf>, %197, %cst_75 [1] : vector<16x16xf32> to vector<16xf32>
    %199 = vector.shape_cast %198 : vector<16xf32> to vector<16x1xf32>
    %200 = vector.broadcast %199 : vector<16x1xf32> to vector<16x16xf32>
    %201 = arith.subf %197, %200 : vector<16x16xf32>
    %202 = math.exp %201 : vector<16x16xf32>
    %cst_76 = arith.constant dense<0.000000e+00> : vector<16xf32>
    %203 = vector.multi_reduction <add>, %202, %cst_76 [1] : vector<16x16xf32> to vector<16xf32>
    %204 = vector.shape_cast %203 : vector<16xf32> to vector<16x1xf32>
    %205 = tpu.reciprocal %204 {approx = true} : vector<16x1xf32> -> vector<16x1xf32>
    %206 = vector.broadcast %205 : vector<16x1xf32> to vector<16x16xf32>
    %207 = arith.mulf %202, %206 : vector<16x16xf32>
    %cst_77 = arith.constant dense<0.000000e+00> : vector<16x32xf32>
    %208 = tpu.matmul %207, %182, %cst_77 {dimension_numbers = #tpu.dot_dimension_numbers<[1], [0], [0], [1], [0, 0, 1, 1], [], []>} : vector<16x16xf32>, vector<16x32xf32>, vector<16x32xf32> -> vector<16x32xf32>
    %cst_78 = arith.constant 0.000000e+00 : f32
    %209 = vector.broadcast %cst_78 : f32 to vector<16x32xf32>
    %210 = arith.cmpf ogt, %208, %209 : vector<16x32xf32>
    %cst_79 = arith.constant 0.000000e+00 : f32
    %211 = vector.broadcast %cst_79 : f32 to vector<16x32xf32>
    %212 = arith.minimumf %208, %211 : vector<16x32xf32>
    %213 = math.exp %212 : vector<16x32xf32>
    %cst_80 = arith.constant 1.000000e+00 : f32
    %214 = vector.broadcast %cst_80 : f32 to vector<16x32xf32>
    %215 = arith.subf %213, %214 : vector<16x32xf32>
    %216 = arith.select %210, %208, %215 : vector<16x32xi1>, vector<16x32xf32>
    %c0_81 = arith.constant 0 : index
    %c0_82 = arith.constant 0 : index
    %217 = vector.load %arg8[%c0_81, %c0_82] : memref<16x32xf32, #tpu.memory_space<vmem>>, vector<16x32xf32>
    tpu.vector_store %arg8[%c0_81, %c0_82], %216 {strides = array<i32>} : memref<16x32xf32, #tpu.memory_space<vmem>>, vector<16x32xf32>,
    return
  }
}

</mosaic_0001>

<bundles_post_ra>
// kernel: tpu_custom_call.1
= control target key start
LH: loop header
LB: loop body
LE: loop exit
PB: predicated region body
PF: predicated region fallthrough
CT: control target
= control target key end

     0   :  { %13 = vsyncpa [#allocation3], 0  ;;  %s2665_s0 = inlined_call_operand.hbm [shape: f32[16,32], index: 0, kind: input, shape index: {}]   ;;  %s2666_s1 = inlined_call_operand.hbm [shape: f32[16,16], index: 1, kind: input, shape index: {}]   ;;  %s2667_s2 = inlined_call_operand.hbm [shape: f32[4,32,32], index: 2, kind: input, shape index: {}]   ;;  %s2668_s3 = inlined_call_operand.vmem [shape: f32[4,32], index: 3, kind: input, shape index: {}]   ;;  %s2669_s4 = inlined_call_operand.hbm [shape: f32[4,32], index: 4, kind: input, shape index: {}]   ;;  %s2670_s5 = inlined_call_operand.hbm [shape: f32[4,32,32], index: 5, kind: input, shape index: {}]   ;;  %s2671_s6 = inlined_call_operand.vmem [shape: f32[1,32], index: 6, kind: input, shape index: {}]   ;;  %s2672_s7 = inlined_call_operand.vmem [shape: f32[1,32], index: 7, kind: input, shape index: {}]   ;;  %s2673_s8 = inlined_call_operand.hbm [shape: f32[16,32], index: 8, kind: output, shape index: {}]  }
   0x1   :  { %14 = vsyncpa [#allocation6], 0 }
   0x2   :  { %15 = vsyncpa [#allocation9], 0 }
   0x3   :  { %16 = vsyncpa [#allocation4], 0  ;;  %s2388_s27 = smov [#allocation5]   ;;  %s2389_s29 = smov [#allocation8]  }
   0x4   :  { %s34_s28 = sshll.u32 %s2388_s27, 4  ;;  %s61_s30 = sshll.u32 %s2389_s29, 4  ;;  %s35_s28 = int_to_ptr.vmem [resolvable:$true] %s34_s28  ;;  %s62_s30 = int_to_ptr.vmem [resolvable:$true] %s61_s30 }
   0x5   :  { %s2268_s9 = scalar_lea.vmem %s35_s28, 256  ;;  %p2273_p1 = scmp.lt.s32.totalorder %s35_s28, %s35_s28 }
   0x6   :  { %p2269_p0 = scmp.ne.s32.totalorder %s35_s28, %s2268_s9  ;;  %p2274_p2 = scmp.lt.s32.totalorder %s2268_s9, %s2268_s9 }
   0x8   :  { %p2275_p3 = por %p2274_p2, %p2273_p1 }
   0xa   :  { %p2276_p4 = pnand %p2275_p3, %p2269_p0 }
   0xc   :  { %2279 = shalt.err (!%p2276_p4)
}
   0xd   :  { %s2390_s10 = smov 128   ;;  %s2391_s11 = smov 8  }
   0xe   :  { %40 = dma.hbm_to_vmem [thread:$0]  %s2666_s1, 256, %s35_s28, [#allocation6], %s2390_s10, %s2390_s10, %s2391_s11  }
   0xf   :  { %s2288_s14 = scalar_lea.vmem %s62_s30, 64  ;;  %p2293_p6 = scmp.lt.s32.totalorder %s62_s30, %s62_s30 }
  0x10   :  { %p2289_p5 = scmp.ne.s32.totalorder %s62_s30, %s2288_s14  ;;  %p2294_p7 = scmp.lt.s32.totalorder %s2288_s14, %s2288_s14 }
  0x12   :  { %p2295_p8 = por %p2294_p7, %p2293_p6 }
  0x14   :  { %p2296_p9 = pnand %p2295_p8, %p2289_p5 }
  0x16   :  { %2299 = shalt.err (!%p2296_p9)
}
  0x17   :  { %64 = dma.hbm_to_vmem [thread:$0]  %s2669_s4, 64, %s62_s30, [#allocation9]  }
  0x18   :  { %s2392_s17 = smov [#allocation2]   ;;  %s2393_s19 = smov [#allocation7]  }
  0x19   :  { %s22_s18 = sshll.u32 %s2392_s17, 4  ;;  %s46_s20 = sshll.u32 %s2393_s19, 4  ;;  %s23_s18 = int_to_ptr.vmem [resolvable:$true] %s22_s18  ;;  %s47_s20 = int_to_ptr.vmem [resolvable:$true] %s46_s20 }
  0x1a   :  { %s2308_s21 = scalar_lea.vmem %s23_s18, 256  ;;  %p2313_p11 = scmp.lt.s32.totalorder %s23_s18, %s23_s18 }
  0x1b   :  { %p2309_p10 = scmp.ne.s32.totalorder %s23_s18, %s2308_s21  ;;  %p2314_p12 = scmp.lt.s32.totalorder %s2308_s21, %s2308_s21 }
  0x1d   :  { %p2315_p13 = por %p2314_p12, %p2313_p11 }
  0x1f   :  { %p2316_p0 = pnand %p2315_p13, %p2309_p10 }
  0x21   :  { %2319 = shalt.err (!%p2316_p0)
}
  0x22   :  { %28 = dma.hbm_to_vmem [thread:$0]  %s2665_s0, 256, %s23_s18, [#allocation3], %s2390_s10, %s2390_s10, %s2391_s11  }
  0x23   :  { %s2328_s4 = scalar_lea.vmem %s47_s20, 2048  ;;  %p2333_p2 = scmp.lt.s32.totalorder %s47_s20, %s47_s20 }
  0x24   :  { %p2329_p1 = scmp.ne.s32.totalorder %s47_s20, %s2328_s4  ;;  %p2334_p3 = scmp.lt.s32.totalorder %s2328_s4, %s2328_s4 }
  0x26   :  { %p2335_p4 = por %p2334_p3, %p2333_p2 }
  0x28   :  { %p2336_p5 = pnand %p2335_p4, %p2329_p1 }
  0x2a   :  { %2339 = shalt.err (!%p2336_p5)
}
  0x2b   :  { %52 = dma.hbm_to_vmem [thread:$0]  %s2667_s2, 2048, %s47_s20, [#allocation6], %s2390_s10, %s2390_s10, %s2391_s11  }
  0x2c   :  { %s2394_s25 = smov [#allocation10]  }
  0x2d   :  { %s70_s26 = sshll.u32 %s2394_s25, 4  ;;  %s71_s26 = int_to_ptr.vmem [resolvable:$true] %s70_s26 }
  0x2e   :  { %s2348_s27 = scalar_lea.vmem %s71_s26, 2048  ;;  %p2353_p7 = scmp.lt.s32.totalorder %s71_s26, %s71_s26 }
  0x2f   :  { %p2349_p6 = scmp.ne.s32.totalorder %s71_s26, %s2348_s27  ;;  %p2354_p8 = scmp.lt.s32.totalorder %s2348_s27, %s2348_s27 }
  0x31   :  { %p2355_p9 = por %p2354_p8, %p2353_p7 }
  0x33   :  { %p2356_p10 = pnand %p2355_p9, %p2349_p6 }
  0x35   :  { %2359 = shalt.err (!%p2356_p10)
}
  0x36   :  { %76 = dma.hbm_to_vmem [thread:$0]  %s2670_s5, 2048, %s71_s26, [#allocation9], %s2390_s10, %s2390_s10, %s2391_s11  }
  0x37   :  { %2380 = dma.done.wait [#allocation3], 256  }
  0x38   :  { %2381 = vsyncadd [#allocation3], 4294967040 }
  0x39   :  { %2382 = dma.done.wait [#allocation6], 2304  }
  0x3a   :  { %2383 = vsyncadd [#allocation6], 4294964992 }
  0x3b   :  { %2384 = dma.done.wait [#allocation9], 2112  }
  0x3c   :  { %2385 = vsyncadd [#allocation9], 4294965184  ;;  %vm138_vm0 = vcmask 261120   ;;  %v105_v0 = vld [vmem:[#allocation7 + $0x18] sm:$0xff]  ;;  %v104_v1 = vld [vmem:[#allocation7 + $0x10] sm:$0xff]  ;;  %v2395_v6 = vmov 0.0   ;;  %v220_v7 = vlaneseq }
  0x3d   :  { %2032 = vmatprep.subr.mxu0 %v105_v0  ;;  %v2470_v2 = vld [vmem:[#allocation2] sm:$0xff]  ;;  %v103_v3 = vld [vmem:[#allocation7 + $0x8] sm:$0xff]  ;;  %2043 = vmatprep.subr.mxu1 %v2395_v6  ;;  %vm2396_vm1 = vmmov 0   ;;  %v109_v19 = vld [vmem:[#allocation7 + $0x38] sm:$0xff]  ;;  %vm325_vm5 = vcmask 130048  }
  0x3e   :  { %2033 = vmatpush3.msra.mxu0 %v105_v0  ;;  %2040 = vmatprep.mubr.msk.f32.mxu0 %vm138_vm0, %v2470_v2  ;;  %v102_v4 = vld [vmem:[#allocation7] sm:$0xff]  ;;  %v2474_v5 = vld [vmem:[#allocation2 + $0x8] sm:$0xff]  ;;  %v2481_v8 = vshrl.u32 %v220_v7, 7  ;;  %v108_v20 = vld [vmem:[#allocation7 + $0x30] sm:$0xff] }
  0x3f   :  { %2034 = vmatprep.subr.mxu0 %v104_v1  ;;  %2047 = vmatprep.mubr.msk.f32.mxu1 %vm2396_vm1, %v2395_v6  ;;  %v2489_v10 = vld [vmem:[%s2668_s3] sm:$0xf]  ;;  %v107_v21 = vld [vmem:[#allocation7 + $0x28] sm:$0xff]  ;;  %v2508_v26 = vld [vmem:[#allocation5] sm:$0xff] }
  0x40   :  { %2035 = vmatpush3.msra.mxu0 %v104_v1  ;;  %v2484_v9 = vsub.s32 0, %v2481_v8  ;;  %v2497_v16 = vld [vmem:[#allocation8] sm:$0xf]  ;;  %vm100_vm2 = vcmp.gt.f32.partialorder %v2508_v26, 0.0  ;;  %v2511_v31 = vld [vmem:[#allocation5 + $0x8] sm:$0xff]  ;;  %v518_v51 = vsub.s32 1, %v2481_v8 }
  0x41   :  { %2036 = vmatprep.subr.mxu0 %v103_v3  ;;  %v106_v22 = vld [vmem:[#allocation7 + $0x20] sm:$0xff]  ;;  %vm101_vm6 = vcmp.gt.f32.partialorder %v2511_v31, 0.0  ;;  %v528_v0 = vrot.slane %v2497_v16, 1 }
  0x42   :  { %2037 = vmatpush3.msra.mxu0 %v103_v3  ;;  %v223_v12 = vrot.slane %v2489_v10, %v2484_v9  ;;  %v519_v53 = vrot.slane %v2489_v10, %v518_v51 }
  0x43   :  { %2038 = vmatprep.subr.mxu0 %v102_v4 }
  0x44   :  { %2039 = vmatpush3.msra.mxu0 %v102_v4 }
  0x45   :  { %2041 = vmatmul.mubr.msk.f32.vlgmr.msra.gmra.mxu0 %vm138_vm0, %v2474_v5 }
 0x105   :  { %v2042_v11 = vpop.f32.mrf.mxu0 }
 0x106   :  { %2044 = vmatpush3.xpose.msk.msra.mxu1 %vm138_vm0, %v2042_v11  ;;  %2050 = vmatprep.subr.mxu0 %v2042_v11  ;;  %v225_v17 = vmul.f32 %v2042_v11, %v223_v12 }
 0x107   :  { %v211_v13 = vpop.f32.mrf.mxu0  ;;  %2051 = vmatpush3.msra.mxu0 %v2042_v11  ;;  %2045 = vmatprep.subr.mxu1 %v2395_v6 }
 0x108   :  { %2052 = vmatprep.subr.mxu0 %v211_v13  ;;  %v224_v14 = vmul.f32 %v223_v12, %v211_v13  ;;  %v229_v18 = vsel %vm138_vm0, %v225_v17, 0.0 }
 0x109   :  { %2053 = vmatpush3.msra.mxu0 %v211_v13 }
 0x10a   :  { %2046 = vmatpush3.xpose.msk.msra.mxu1 %vm138_vm0, %v211_v13  ;;  %v226_v15 = vsel %vm138_vm0, %v224_v14, 0.0  ;;  %2068 = vmatprep.subr.mxu0 %v2395_v6 }
 0x10b   :  { %227 = vadd.xlane.f32.xlu0 %v226_v15  ;;  %2057 = vmatprep.subr.mxu1 %v109_v19 }
 0x10d   :  { %2048 = vmatmul.mubr.msk.f32.vlgmr.msra.gmra.mxu1 %vm138_vm0, %v2497_v16 }
 0x10e   :  { %2065 = vmatprep.mubr.msk.f32.mxu1 %vm138_vm0, %v2470_v2  ;;  %2058 = vmatpush3.msra.mxu1 %v109_v19 }
 0x10f   :  { %230 = vadd.xlane.f32.xlu0 %v229_v18  ;;  %2059 = vmatprep.subr.mxu1 %v108_v20 }
 0x110   :  { %2060 = vmatpush3.msra.mxu1 %v108_v20 }
 0x111   :  { %2061 = vmatprep.subr.mxu1 %v107_v21 }
 0x112   :  { %2062 = vmatpush3.msra.mxu1 %v107_v21 }
 0x113   :  { %2063 = vmatprep.subr.mxu1 %v106_v22 }
 0x114   :  { %2064 = vmatpush3.msra.mxu1 %v106_v22 }
 0x115   :  { %2066 = vmatmul.mubr.msk.f32.vlgmr.msra.gmra.mxu1 %vm138_vm0, %v2474_v5 }
 0x194   :  { %v228_v23 = vpop.xlane.xlu0 %227 }
 0x198   :  { %v231_v27 = vpop.xlane.xlu0 %230 }
 0x1cd   :  { %v307_v24 = vpop.f32.mrf.mxu1 }
 0x1ce   :  { %v314_v25 = vrot.slane %v307_v24, %v2484_v9 }
 0x1cf   :  { %v2049_v28 = vpop.f32.mrf.mxu1 }
 0x1d0   :  { %v315_v29 = vadd.f32 %v314_v25, %v228_v23  ;;  %v316_v30 = vadd.f32 %v314_v25, %v231_v27 }
 0x1d2   :  { %vm317_vm3 = vcmp.gt.f32.partialorder %v315_v29, 0.0  ;;  %v319_v32 = vmul.f32 0.01, %v315_v29  ;;  %vm318_vm4 = vcmp.gt.f32.partialorder %v316_v30, 0.0  ;;  %v320_v33 = vmul.f32 0.01, %v316_v30 }
 0x1d4   :  { %v321_v34 = vsel %vm317_vm3, %v315_v29, %v319_v32  ;;  %v322_v35 = vsel %vm318_vm4, %v316_v30, %v320_v33 }
 0x1d5   :  { %v323_v36 = vsel %vm100_vm2, %v321_v34, -9e+15  ;;  %v324_v38 = vsel %vm101_vm6, %v322_v35, -9e+15  ;;  %v2067_v50 = vpop.f32.mrf.mxu1 }
 0x1d6   :  { %v326_v37 = vsel %vm325_vm5, %v323_v36, -inf  ;;  %v329_v39 = vsel %vm325_vm5, %v324_v38, -inf  ;;  %2075 = vmatprep.subr.mxu1 %v2067_v50  ;;  %v521_v55 = vmul.f32 %v2067_v50, %v519_v53 }
 0x1d7   :  { %327 = vmax.xlane.f32.xlu1 %v326_v37  ;;  %v507_v52 = vpop.f32.mrf.mxu1  ;;  %2076 = vmatpush3.msra.mxu1 %v2067_v50  ;;  %v123_v37 = vld [vmem:[#allocation10 + $0x18] sm:$0xff] }
 0x1d8   :  { %2077 = vmatprep.subr.mxu1 %v507_v52  ;;  %v520_v54 = vmul.f32 %v519_v53, %v507_v52  ;;  %v525_v57 = vsel %vm138_vm0, %v521_v55, 0.0  ;;  %v121_v53 = vld [vmem:[#allocation10 + $0x8] sm:$0xff]  ;;  %v120_v55 = vld [vmem:[#allocation10] sm:$0xff] }
 0x1d9   :  { %2078 = vmatpush3.msra.mxu1 %v507_v52 }
 0x1da   :  { %v522_v56 = vsel %vm138_vm0, %v520_v54, 0.0  ;;  %2093 = vmatprep.subr.mxu1 %v123_v37 }
 0x1db   :  { %330 = vmax.xlane.f32.xlu1 %v329_v39 }
 0x260   :  { %v328_v40 = vpop.xlane.xlu1 %327 }
 0x261   :  { %v332_v41 = vsub.f32 %v323_v36, %v328_v40 }
 0x263   :  { %v334_v42 = vmul.f32 1.442695, %v332_v41 }
 0x264   :  { %v331_v43 = vpop.xlane.xlu1 %330 }
 0x265   :  { %2200 = vpow2.f32 %v334_v42  ;;  %v333_v44 = vsub.f32 %v324_v38, %v331_v43 }
 0x267   :  { %v336_v45 = vmul.f32 1.442695, %v333_v44 }
 0x269   :  { %2202 = vpow2.f32 %v336_v45 }
 0x272   :  { %v2201_v46 = vpop.eup %2200 }
 0x273   :  { %v338_v47 = vsel %vm325_vm5, %v2201_v46, 0.0 }
 0x274   :  { %339 = vadd.xlane.f32.xlu0 %v338_v47 }
 0x276   :  { %v2203_v48 = vpop.eup %2202 }
 0x277   :  { %v341_v49 = vsel %vm325_vm5, %v2203_v48, 0.0 }
 0x278   :  { %342 = vadd.xlane.f32.xlu1 %v341_v49  ;;  %523 = vadd.xlane.f32.xlu0 %v522_v56 }
 0x27c   :  { %526 = vadd.xlane.f32.xlu1 %v525_v57  ;;  %v127_v57 = vld [vmem:[#allocation10 + $0x38] sm:$0xff] }
 0x2fd   :  { %v340_v58 = vpop.xlane.xlu0 %339 }
 0x2fe   :  { %2204 = vrcp.f32 %v340_v58  ;;  %v126_v58 = vld [vmem:[#allocation10 + $0x30] sm:$0xff] }
 0x301   :  { %v343_v59 = vpop.xlane.xlu1 %342  ;;  %v524_v12 = vpop.xlane.xlu0 %523 }
 0x302   :  { %2206 = vrcp.f32 %v343_v59  ;;  %v125_v59 = vld [vmem:[#allocation10 + $0x28] sm:$0xff] }
 0x305   :  { %v527_v7 = vpop.xlane.xlu1 %526 }
 0x30b   :  { %v2205_v60 = vpop.eup %2204 }
 0x30c   :  { %v346_v61 = vmul.f32 %v2205_v60, %v2201_v46  ;;  %v124_v60 = vld [vmem:[#allocation10 + $0x20] sm:$0xff] }
 0x30e   :  { %2054 = vmatprep.mubr.msk.f32.mxu0 %vm325_vm5, %v346_v61  ;;  %v113_v61 = vld [vmem:[#allocation7 + $0x58] sm:$0xff] }
 0x30f   :  { %v2207_v62 = vpop.eup %2206 }
 0x310   :  { %v347_v63 = vmul.f32 %v2207_v62, %v2203_v48 }
 0x312   :  { %2055 = vmatmul.mubr.msk.f32.vlgmr.msra.gmra.mxu0 %vm325_vm5, %v347_v63 }
 0x313   :  { %2069 = vmatpush3.xpose.msk.msra.mxu0 %vm138_vm0, %v2067_v50  ;;  %2072 = vmatprep.mubr.msk.f32.mxu0 %vm2396_vm1, %v2395_v6  ;;  %v122_v50 = vld [vmem:[#allocation10 + $0x10] sm:$0xff] }
 0x314   :  { %2070 = vmatprep.subr.mxu0 %v2395_v6 }
 0x317   :  { %2071 = vmatpush3.xpose.msk.msra.mxu0 %vm138_vm0, %v507_v52 }
 0x318   :  { %2082 = vmatprep.subr.mxu0 %v127_v57 }
 0x31a   :  { %2073 = vmatmul.mubr.msk.f32.vlgmr.msra.gmra.mxu0 %vm138_vm0, %v528_v0 }
 0x31b   :  { %2083 = vmatpush3.msra.mxu0 %v127_v57 }
 0x31c   :  { %2084 = vmatprep.subr.mxu0 %v126_v58 }
 0x31d   :  { %2085 = vmatpush3.msra.mxu0 %v126_v58 }
 0x31e   :  { %2086 = vmatprep.subr.mxu0 %v125_v59 }
 0x31f   :  { %2087 = vmatpush3.msra.mxu0 %v125_v59 }
 0x320   :  { %2088 = vmatprep.subr.mxu0 %v124_v60 }
 0x321   :  { %2089 = vmatpush3.msra.mxu0 %v124_v60  ;;  %v117_v60 = vld [vmem:[#allocation7 + $0x78] sm:$0xff] }
 0x322   :  { %2104 = vmatprep.subr.mxu0 %v113_v61 }
 0x3d2   :  { %v2535_v1 = vpop.f32.mrf.mxu0 }
 0x3d3   :  { %v432_v40 = vmin.f32 %v2535_v1, 0.0  ;;  %vm430_vm10 = vcmp.gt.f32.partialorder %v2535_v1, 0.0 }
 0x3d4   :  { %v420_v3 = vpop.f32.mrf.mxu0 }
 0x3d5   :  { %v431_v38 = vmin.f32 %v420_v3, 0.0  ;;  %v435_v43 = vmul.f32 1.442695, %v432_v40  ;;  %vm429_vm9 = vcmp.gt.f32.partialorder %v420_v3, 0.0 }
 0x3d7   :  { %v433_v39 = vmul.f32 1.442695, %v431_v38 }
 0x3da   :  { %v603_v4 = vpop.f32.mrf.mxu0 }
 0x3db   :  { %v610_v11 = vrot.slane %v603_v4, %v2484_v9 }
 0x3dc   :  { %v2074_v13 = vpop.f32.mrf.mxu0 }
 0x3dd   :  { %v611_v14 = vadd.f32 %v610_v11, %v524_v12  ;;  %v612_v15 = vadd.f32 %v610_v11, %v527_v7 }
 0x3df   :  { %vm614_vm7 = vcmp.gt.f32.partialorder %v612_v15, 0.0  ;;  %v616_v17 = vmul.f32 0.01, %v612_v15  ;;  %vm613_vm8 = vcmp.gt.f32.partialorder %v611_v14, 0.0  ;;  %v615_v18 = vmul.f32 0.01, %v611_v14 }
 0x3e1   :  { %v618_v19 = vsel %vm614_vm7, %v612_v15, %v616_v17  ;;  %v617_v20 = vsel %vm613_vm8, %v611_v14, %v615_v18  ;;  %v112_v17 = vld [vmem:[#allocation7 + $0x50] sm:$0xff]  ;;  %v111_v18 = vld [vmem:[#allocation7 + $0x48] sm:$0xff] }
 0x3e2   :  { %v620_v21 = vsel %vm101_vm6, %v618_v19, -9e+15  ;;  %v619_v22 = vsel %vm100_vm2, %v617_v20, -9e+15  ;;  %v110_v19 = vld [vmem:[#allocation7 + $0x40] sm:$0xff]  ;;  %v975_v20 = vsub.s32 2, %v2481_v8 }
 0x3e3   :  { %v624_v23 = vsel %vm325_vm5, %v620_v21, -inf  ;;  %v621_v24 = vsel %vm325_vm5, %v619_v22, -inf }
 0x3e4   :  { %625 = vmax.xlane.f32.xlu1 %v624_v23  ;;  %622 = vmax.xlane.f32.xlu0 %v621_v24 }
 0x46d   :  { %v626_v25 = vpop.xlane.xlu1 %625  ;;  %v623_v27 = vpop.xlane.xlu0 %622 }
 0x46e   :  { %v628_v28 = vsub.f32 %v620_v21, %v626_v25  ;;  %v627_v29 = vsub.f32 %v619_v22, %v623_v27  ;;  %v976_v22 = vrot.slane %v2489_v10, %v975_v20 }
 0x470   :  { %v631_v30 = vmul.f32 1.442695, %v628_v28  ;;  %v629_v32 = vmul.f32 1.442695, %v627_v29 }
 0x472   :  { %2208 = vpow2.f32 %v631_v30  ;;  %v985_v30 = vrot.slane %v2497_v16, 2 }
 0x473   :  { %2210 = vpow2.f32 %v629_v32 }
 0x474   :  { %2212 = vpow2.f32 %v433_v39 }
 0x47f   :  { %v2209_v33 = vpop.eup %2208 }
 0x480   :  { %v2211_v34 = vpop.eup %2210  ;;  %v636_v35 = vsel %vm325_vm5, %v2209_v33, 0.0 }
 0x481   :  { %637 = vadd.xlane.f32.xlu1 %v636_v35  ;;  %v633_v36 = vsel %vm325_vm5, %v2211_v34, 0.0  ;;  %v2213_v44 = vpop.eup %2212 }
 0x482   :  { %634 = vadd.xlane.f32.xlu0 %v633_v36  ;;  %v1904_v48 = vadd.f32 -1.0, %v2213_v44 }
 0x484   :  { %v439_v52 = vsel %vm429_vm9, %v420_v3, %v1904_v48 }
 0x50a   :  { %v638_v41 = vpop.xlane.xlu1 %637 }
 0x50b   :  { %2214 = vrcp.f32 %v638_v41  ;;  %v635_v42 = vpop.xlane.xlu0 %634 }
 0x50c   :  { %2216 = vrcp.f32 %v635_v42 }
 0x50d   :  { %2218 = vpow2.f32 %v435_v43 }
 0x518   :  { %v2215_v45 = vpop.eup %2214 }
 0x519   :  { %v2217_v46 = vpop.eup %2216  ;;  %v642_v47 = vmul.f32 %v2215_v45, %v2209_v33 }
 0x51a   :  { %v641_v49 = vmul.f32 %v2217_v46, %v2211_v34  ;;  %v2219_v51 = vpop.eup %2218 }
 0x51b   :  { %v1905_v54 = vadd.f32 -1.0, %v2219_v51 }
 0x51c   :  { %2079 = vmatprep.mubr.msk.f32.mxu1 %vm325_vm5, %v641_v49 }
 0x51d   :  { %2080 = vmatmul.mubr.msk.f32.vlgmr.msra.gmra.mxu1 %vm325_vm5, %v642_v47  ;;  %v440_v56 = vsel %vm430_vm10, %v2535_v1, %v1905_v54 }
 0x51e   :  { %2094 = vmatpush3.msra.mxu1 %v123_v37  ;;  %2101 = vmatprep.mubr.msk.f32.mxu1 %vm138_vm0, %v439_v52 }
 0x51f   :  { %2095 = vmatprep.subr.mxu1 %v122_v50 }
 0x520   :  { %2096 = vmatpush3.msra.mxu1 %v122_v50 }
 0x521   :  { %2097 = vmatprep.subr.mxu1 %v121_v53 }
 0x522   :  { %2098 = vmatpush3.msra.mxu1 %v121_v53 }
 0x523   :  { %2099 = vmatprep.subr.mxu1 %v120_v55 }
 0x524   :  { %2100 = vmatpush3.msra.mxu1 %v120_v55 }
 0x525   :  { %2102 = vmatmul.mubr.msk.f32.vlgmr.msra.gmra.mxu1 %vm138_vm0, %v440_v56  ;;  %2115 = vmatprep.subr.mxu1 %v2395_v6 }
 0x526   :  { %2119 = vmatprep.mubr.msk.f32.mxu1 %vm2396_vm1, %v2395_v6 }
 0x5dd   :  { %v2081_v62 = vpop.f32.mrf.mxu1 }
 0x5de   :  { %v727_v63 = vmin.f32 %v2081_v62, 0.0  ;;  %vm725_vm12 = vcmp.gt.f32.partialorder %v2081_v62, 0.0 }
 0x5df   :  { %v715_v0 = vpop.f32.mrf.mxu1 }
 0x5e0   :  { %v730_v1 = vmul.f32 1.442695, %v727_v63  ;;  %v726_v3 = vmin.f32 %v715_v0, 0.0  ;;  %vm724_vm11 = vcmp.gt.f32.partialorder %v715_v0, 0.0 }
 0x5e2   :  { %2220 = vpow2.f32 %v730_v1  ;;  %v728_v4 = vmul.f32 1.442695, %v726_v3 }
 0x5e4   :  { %2222 = vpow2.f32 %v728_v4  ;;  %v116_v4 = vld [vmem:[#allocation7 + $0x70] sm:$0xff] }
 0x5e5   :  { %v2575_v33 = vpop.f32.mrf.mxu1 }
 0x5e7   :  { %v2577_v34 = vpop.f32.mrf.mxu1 }
 0x5ef   :  { %v2221_v7 = vpop.eup %2220 }
 0x5f0   :  { %v1914_v12 = vadd.f32 -1.0, %v2221_v7  ;;  %v115_v7 = vld [vmem:[#allocation7 + $0x68] sm:$0xff] }
 0x5f1   :  { %v2223_v11 = vpop.eup %2222 }
 0x5f2   :  { %v1913_v13 = vadd.f32 -1.0, %v2223_v11  ;;  %v735_v15 = vsel %vm725_vm12, %v2081_v62, %v1914_v12  ;;  %v114_v11 = vld [vmem:[#allocation7 + $0x60] sm:$0xff] }
 0x5f3   :  { %v131_v12 = vld [vmem:[#allocation10 + $0x58] sm:$0xff] }
 0x5f4   :  { %v734_v14 = vsel %vm724_vm11, %v715_v0, %v1913_v13  ;;  %v130_v13 = vld [vmem:[#allocation10 + $0x50] sm:$0xff] }
 0x5f5   :  { %2090 = vmatprep.mubr.msk.f32.mxu0 %vm138_vm0, %v734_v14  ;;  %v129_v14 = vld [vmem:[#allocation10 + $0x48] sm:$0xff] }
 0x5f6   :  { %2091 = vmatmul.mubr.msk.f32.vlgmr.msra.gmra.mxu0 %vm138_vm0, %v735_v15 }
 0x5f7   :  { %2105 = vmatpush3.msra.mxu0 %v113_v61  ;;  %2112 = vmatprep.mubr.msk.f32.mxu0 %vm138_vm0, %v2470_v2 }
 0x5f8   :  { %2106 = vmatprep.subr.mxu0 %v112_v17 }
 0x5f9   :  { %2107 = vmatpush3.msra.mxu0 %v112_v17 }
 0x5fa   :  { %2108 = vmatprep.subr.mxu0 %v111_v18 }
 0x5fb   :  { %2109 = vmatpush3.msra.mxu0 %v111_v18  ;;  %v1353_v18 = vsub.s32 3, %v2481_v8 }
 0x5fc   :  { %2110 = vmatprep.subr.mxu0 %v110_v19 }
 0x5fd   :  { %2111 = vmatpush3.msra.mxu0 %v110_v19 }
 0x5fe   :  { %2113 = vmatmul.mubr.msk.f32.vlgmr.msra.gmra.mxu0 %vm138_vm0, %v2474_v5 }
 0x6b6   :  { %v2563_v21 = vpop.f32.mrf.mxu0 }
 0x6b8   :  { %v2566_v23 = vpop.f32.mrf.mxu0 }
 0x6be   :  { %v2114_v24 = vpop.f32.mrf.mxu0 }
 0x6bf   :  { %2116 = vmatpush3.xpose.msk.msra.mxu1 %vm138_vm0, %v2114_v24  ;;  %2122 = vmatprep.subr.mxu0 %v2114_v24  ;;  %v978_v25 = vmul.f32 %v2114_v24, %v976_v22 }
 0x6c0   :  { %v964_v27 = vpop.f32.mrf.mxu0  ;;  %2123 = vmatpush3.msra.mxu0 %v2114_v24  ;;  %2117 = vmatprep.subr.mxu1 %v2395_v6  ;;  %v1354_v24 = vrot.slane %v2489_v10, %v1353_v18 }
 0x6c1   :  { %2124 = vmatprep.subr.mxu0 %v964_v27  ;;  %v982_v28 = vsel %vm138_vm0, %v978_v25, 0.0  ;;  %v977_v29 = vmul.f32 %v976_v22, %v964_v27 }
 0x6c2   :  { %983 = vadd.xlane.f32.xlu1 %v982_v28  ;;  %2125 = vmatpush3.msra.mxu0 %v964_v27 }
 0x6c3   :  { %2118 = vmatpush3.xpose.msk.msra.mxu1 %vm138_vm0, %v964_v27  ;;  %v979_v32 = vsel %vm138_vm0, %v977_v29, 0.0  ;;  %2140 = vmatprep.subr.mxu0 %v117_v60 }
 0x6c4   :  { %980 = vadd.xlane.f32.xlu0 %v979_v32  ;;  %2129 = vmatprep.subr.mxu1 %v131_v12 }
 0x6c6   :  { %2120 = vmatmul.mubr.msk.f32.vlgmr.msra.gmra.mxu1 %vm138_vm0, %v985_v30 }
 0x6c7   :  { %2130 = vmatpush3.msra.mxu1 %v131_v12 }
 0x6c8   :  { %2131 = vmatprep.subr.mxu1 %v130_v13 }
 0x6c9   :  { %2132 = vmatpush3.msra.mxu1 %v130_v13 }
 0x6ca   :  { %2133 = vmatprep.subr.mxu1 %v129_v14 }
 0x6cb   :  { %2134 = vmatpush3.msra.mxu1 %v129_v14  ;;  %v135_v14 = vld [vmem:[#allocation10 + $0x78] sm:$0xff] }
 0x74b   :  { %v984_v36 = vpop.xlane.xlu1 %983 }
 0x74d   :  { %v981_v38 = vpop.xlane.xlu0 %980 }
 0x786   :  { %v1060_v35 = vpop.f32.mrf.mxu1 }
 0x787   :  { %v1067_v37 = vrot.slane %v1060_v35, %v2484_v9 }
 0x788   :  { %v2121_v39 = vpop.f32.mrf.mxu1 }
 0x789   :  { %v1068_v40 = vadd.f32 %v1067_v37, %v981_v38  ;;  %v1069_v41 = vadd.f32 %v1067_v37, %v984_v36  ;;  %v1363_v39 = vrot.slane %v2497_v16, 3 }
 0x78b   :  { %vm1071_vm13 = vcmp.gt.f32.partialorder %v1069_v41, 0.0  ;;  %v1073_v42 = vmul.f32 0.01, %v1069_v41  ;;  %vm1070_vm14 = vcmp.gt.f32.partialorder %v1068_v40, 0.0  ;;  %v1072_v43 = vmul.f32 0.01, %v1068_v40 }
 0x78d   :  { %v1075_v44 = vsel %vm1071_vm13, %v1069_v41, %v1073_v42  ;;  %v1074_v45 = vsel %vm1070_vm14, %v1068_v40, %v1072_v43  ;;  %v895_v40 = vadd.f32 %v2575_v33, %v2563_v21  ;;  %v890_v42 = vadd.f32 %v2577_v34, %v2566_v23 }
 0x78e   :  { %v1077_v46 = vsel %vm101_vm6, %v1075_v44, -9e+15  ;;  %v1076_v47 = vsel %vm100_vm2, %v1074_v45, -9e+15 }
 0x78f   :  { %v1081_v48 = vsel %vm325_vm5, %v1077_v46, -inf  ;;  %v1078_v49 = vsel %vm325_vm5, %v1076_v47, -inf }
 0x790   :  { %1082 = vmax.xlane.f32.xlu1 %v1081_v48  ;;  %1079 = vmax.xlane.f32.xlu0 %v1078_v49 }
 0x819   :  { %v1083_v50 = vpop.xlane.xlu1 %1082  ;;  %v1080_v51 = vpop.xlane.xlu0 %1079 }
 0x81a   :  { %v1085_v52 = vsub.f32 %v1077_v46, %v1083_v50  ;;  %v1084_v53 = vsub.f32 %v1076_v47, %v1080_v51 }
 0x81c   :  { %v1088_v54 = vmul.f32 1.442695, %v1085_v52  ;;  %v1086_v55 = vmul.f32 1.442695, %v1084_v53 }
 0x81e   :  { %2224 = vpow2.f32 %v1088_v54 }
 0x81f   :  { %2226 = vpow2.f32 %v1086_v55 }
 0x82b   :  { %v2225_v56 = vpop.eup %2224 }
 0x82c   :  { %v2227_v57 = vpop.eup %2226  ;;  %v1093_v58 = vsel %vm325_vm5, %v2225_v56, 0.0 }
 0x82d   :  { %1094 = vadd.xlane.f32.xlu1 %v1093_v58  ;;  %v1090_v59 = vsel %vm325_vm5, %v2227_v57, 0.0 }
 0x82e   :  { %1091 = vadd.xlane.f32.xlu0 %v1090_v59 }
 0x8b6   :  { %v1095_v61 = vpop.xlane.xlu1 %1094 }
 0x8b7   :  { %2228 = vrcp.f32 %v1095_v61  ;;  %v1092_v62 = vpop.xlane.xlu0 %1091 }
 0x8b8   :  { %2230 = vrcp.f32 %v1092_v62 }
 0x8c4   :  { %v2229_v63 = vpop.eup %2228 }
 0x8c5   :  { %v2231_v0 = vpop.eup %2230  ;;  %v1099_v1 = vmul.f32 %v2229_v63, %v2225_v56 }
 0x8c6   :  { %v1098_v3 = vmul.f32 %v2231_v0, %v2227_v57 }
 0x8c8   :  { %2126 = vmatprep.mubr.msk.f32.mxu0 %vm325_vm5, %v1098_v3 }
 0x8c9   :  { %2127 = vmatmul.mubr.msk.f32.vlgmr.msra.gmra.mxu0 %vm325_vm5, %v1099_v1 }
 0x8ca   :  { %2141 = vmatpush3.msra.mxu0 %v117_v60  ;;  %2148 = vmatprep.mubr.msk.f32.mxu0 %vm138_vm0, %v2470_v2  ;;  %v128_v2 = vld [vmem:[#allocation10 + $0x40] sm:$0xff] }
 0x8cb   :  { %2142 = vmatprep.subr.mxu0 %v116_v4  ;;  %2135 = vmatprep.subr.mxu1 %v128_v2 }
 0x8cc   :  { %2143 = vmatpush3.msra.mxu0 %v116_v4  ;;  %2136 = vmatpush3.msra.mxu1 %v128_v2  ;;  %v134_v2 = vld [vmem:[#allocation10 + $0x70] sm:$0xff] }
 0x8cd   :  { %2144 = vmatprep.subr.mxu0 %v115_v7  ;;  %2151 = vmatprep.subr.mxu1 %v2395_v6 }
 0x8ce   :  { %2145 = vmatpush3.msra.mxu0 %v115_v7 }
 0x8cf   :  { %2146 = vmatprep.subr.mxu0 %v114_v11 }
 0x8d0   :  { %2147 = vmatpush3.msra.mxu0 %v114_v11 }
 0x8d1   :  { %2149 = vmatmul.mubr.msk.f32.vlgmr.msra.gmra.mxu0 %vm138_vm0, %v2474_v5 }
 0x989   :  { %v2128_v15 = vpop.f32.mrf.mxu0 }
 0x98a   :  { %v1184_v17 = vmin.f32 %v2128_v15, 0.0  ;;  %vm1182_vm3 = vcmp.gt.f32.partialorder %v2128_v15, 0.0 }
 0x98b   :  { %v1172_v19 = vpop.f32.mrf.mxu0 }
 0x98c   :  { %v1187_v5 = vmul.f32 1.442695, %v1184_v17  ;;  %v1183_v20 = vmin.f32 %v1172_v19, 0.0  ;;  %vm1181_vm15 = vcmp.gt.f32.partialorder %v1172_v19, 0.0  ;;  %v132_v17 = vld [vmem:[#allocation10 + $0x60] sm:$0xff] }
 0x98e   :  { %2232 = vpow2.f32 %v1187_v5  ;;  %v1185_v22 = vmul.f32 1.442695, %v1183_v20 }
 0x990   :  { %2234 = vpow2.f32 %v1185_v22 }
 0x991   :  { %v2150_v25 = vpop.f32.mrf.mxu0 }
 0x992   :  { %2158 = vmatprep.subr.mxu0 %v2150_v25  ;;  %v1356_v27 = vmul.f32 %v2150_v25, %v1354_v24 }
 0x993   :  { %v1342_v28 = vpop.f32.mrf.mxu0  ;;  %2159 = vmatpush3.msra.mxu0 %v2150_v25 }
 0x994   :  { %2160 = vmatprep.subr.mxu0 %v1342_v28  ;;  %v1360_v29 = vsel %vm138_vm0, %v1356_v27, 0.0  ;;  %v1355_v30 = vmul.f32 %v1354_v24, %v1342_v28 }
 0x995   :  { %2161 = vmatpush3.msra.mxu0 %v1342_v28  ;;  %1361 = vadd.xlane.f32.xlu1 %v1360_v29 }
 0x996   :  { %v1357_v8 = vsel %vm138_vm0, %v1355_v30, 0.0  ;;  %2165 = vmatprep.subr.mxu0 %v135_v14 }
 0x997   :  { %1358 = vadd.xlane.f32.xlu0 %v1357_v8 }
 0x99b   :  { %v2233_v32 = vpop.eup %2232 }
 0x99c   :  { %v1927_v36 = vadd.f32 -1.0, %v2233_v32 }
 0x99d   :  { %v2235_v35 = vpop.eup %2234 }
 0x99e   :  { %v1926_v37 = vadd.f32 -1.0, %v2235_v35  ;;  %v1192_v38 = vsel %vm1182_vm3, %v2128_v15, %v1927_v36  ;;  %v133_v15 = vld [vmem:[#allocation10 + $0x68] sm:$0xff]  ;;  %v1941_v35 = vld [vmem:[%s2671_s6] ss:$0 sm:$0xff] }
 0x9a0   :  { %v1191_v10 = vsel %vm1181_vm15, %v1172_v19, %v1926_v37 }
 0x9a1   :  { %2137 = vmatprep.mubr.msk.f32.mxu1 %vm138_vm0, %v1191_v10 }
 0x9a2   :  { %2138 = vmatmul.mubr.msk.f32.vlgmr.msra.gmra.mxu1 %vm138_vm0, %v1192_v38 }
 0x9a3   :  { %2152 = vmatpush3.xpose.msk.msra.mxu1 %vm138_vm0, %v2150_v25  ;;  %2155 = vmatprep.mubr.msk.f32.mxu1 %vm2396_vm1, %v2395_v6 }
 0x9a4   :  { %2153 = vmatprep.subr.mxu1 %v2395_v6 }
 0x9a7   :  { %2154 = vmatpush3.xpose.msk.msra.mxu1 %vm138_vm0, %v1342_v28 }
 0x9a8   :  { %2176 = vmatprep.subr.mxu1 %v2395_v6 }
 0x9aa   :  { %2156 = vmatmul.mubr.msk.f32.vlgmr.msra.gmra.mxu1 %vm138_vm0, %v1363_v39 }
 0x9ab   :  { %2180 = vmatprep.mubr.msk.f32.mxu1 %vm2396_vm1, %v2395_v6 }
 0xa1e   :  { %v1362_v46 = vpop.xlane.xlu1 %1361 }
 0xa20   :  { %v1359_v48 = vpop.xlane.xlu0 %1358 }
 0xa62   :  { %v2139_v41 = vpop.f32.mrf.mxu1 }
 0xa63   :  { %v2615_v43 = vadd.f32 %v2139_v41, %v895_v40 }
 0xa64   :  { %v1265_v44 = vpop.f32.mrf.mxu1 }
 0xa65   :  { %v2617_v16 = vadd.f32 %v1265_v44, %v890_v42  ;;  %v137_v42 = vld [vmem:[%s2672_s7] sm:$0x1]  ;;  %s2397_s7 = smov [#allocation11]  }
 0xa66   :  { %s1883_s9 = sshll.u32 %s2397_s7, 4  ;;  %s1884_s9 = int_to_ptr.vmem [resolvable:$true] %s1883_s9 }
 0xa67   :  { %s2360_s12 = scalar_lea.vmem %s1884_s9, 256  ;;  %p2365_p12 = scmp.lt.s32.totalorder %s1884_s9, %s1884_s9 }
 0xa68   :  { %p2361_p11 = scmp.ne.s32.totalorder %s1884_s9, %s2360_s12  ;;  %p2366_p13 = scmp.lt.s32.totalorder %s2360_s12, %s2360_s12 }
 0xa6a   :  { %v1438_v45 = vpop.f32.mrf.mxu1  ;;  %p2367_p0 = por %p2366_p13, %p2365_p12 }
 0xa6b   :  { %v1445_v47 = vrot.slane %v1438_v45, %v2484_v9 }
 0xa6c   :  { %v2157_v49 = vpop.f32.mrf.mxu1  ;;  %p2368_p1 = pnand %p2367_p0, %p2361_p11 }
 0xa6d   :  { %v1446_v50 = vadd.f32 %v1445_v47, %v1359_v48  ;;  %v1447_v51 = vadd.f32 %v1445_v47, %v1362_v46 }
 0xa6f   :  { %vm1449_vm1 = vcmp.gt.f32.partialorder %v1447_v51, 0.0  ;;  %v1451_v52 = vmul.f32 0.01, %v1447_v51  ;;  %vm1448_vm4 = vcmp.gt.f32.partialorder %v1446_v50, 0.0  ;;  %v1450_v21 = vmul.f32 0.01, %v1446_v50 }
 0xa71   :  { %v1453_v33 = vsel %vm1449_vm1, %v1447_v51, %v1451_v52  ;;  %v1452_v53 = vsel %vm1448_vm4, %v1446_v50, %v1450_v21 }
 0xa72   :  { %v1455_v23 = vsel %vm101_vm6, %v1453_v33, -9e+15  ;;  %v1454_v34 = vsel %vm100_vm2, %v1452_v53, -9e+15 }
 0xa73   :  { %v1459_v54 = vsel %vm325_vm5, %v1455_v23, -inf  ;;  %v1456_v55 = vsel %vm325_vm5, %v1454_v34, -inf }
 0xa74   :  { %1460 = vmax.xlane.f32.xlu1 %v1459_v54  ;;  %1457 = vmax.xlane.f32.xlu0 %v1456_v55 }
 0xafd   :  { %v1461_v56 = vpop.xlane.xlu1 %1460  ;;  %v1458_v57 = vpop.xlane.xlu0 %1457 }
 0xafe   :  { %v1463_v58 = vsub.f32 %v1455_v23, %v1461_v56  ;;  %v1462_v59 = vsub.f32 %v1454_v34, %v1458_v57 }
 0xb00   :  { %v1466_v60 = vmul.f32 1.442695, %v1463_v58  ;;  %v1464_v61 = vmul.f32 1.442695, %v1462_v59 }
 0xb02   :  { %2236 = vpow2.f32 %v1466_v60 }
 0xb03   :  { %2238 = vpow2.f32 %v1464_v61 }
 0xb0f   :  { %v2237_v62 = vpop.eup %2236 }
 0xb10   :  { %v2239_v63 = vpop.eup %2238  ;;  %v1471_v0 = vsel %vm325_vm5, %v2237_v62, 0.0 }
 0xb11   :  { %1472 = vadd.xlane.f32.xlu1 %v1471_v0  ;;  %v1468_v1 = vsel %vm325_vm5, %v2239_v63, 0.0 }
 0xb12   :  { %1469 = vadd.xlane.f32.xlu0 %v1468_v1 }
 0xb9a   :  { %v1473_v3 = vpop.xlane.xlu1 %1472 }
 0xb9b   :  { %2240 = vrcp.f32 %v1473_v3  ;;  %v1470_v4 = vpop.xlane.xlu0 %1469 }
 0xb9c   :  { %2242 = vrcp.f32 %v1470_v4 }
 0xba8   :  { %v2241_v7 = vpop.eup %2240 }
 0xba9   :  { %v2243_v11 = vpop.eup %2242  ;;  %v1477_v12 = vmul.f32 %v2241_v7, %v2237_v62 }
 0xbaa   :  { %v1476_v13 = vmul.f32 %v2243_v11, %v2239_v63 }
 0xbac   :  { %2162 = vmatprep.mubr.msk.f32.mxu0 %vm325_vm5, %v1476_v13 }
 0xbad   :  { %2163 = vmatmul.mubr.msk.f32.vlgmr.msra.gmra.mxu0 %vm325_vm5, %v1477_v12 }
 0xbae   :  { %2166 = vmatpush3.msra.mxu0 %v135_v14 }
 0xbaf   :  { %2167 = vmatprep.subr.mxu0 %v134_v2 }
 0xbb0   :  { %2168 = vmatpush3.msra.mxu0 %v134_v2 }
 0xbb1   :  { %2169 = vmatprep.subr.mxu0 %v133_v15 }
 0xbb2   :  { %2170 = vmatpush3.msra.mxu0 %v133_v15 }
 0xbb3   :  { %2171 = vmatprep.subr.mxu0 %v132_v17 }
 0xbb4   :  { %2172 = vmatpush3.msra.mxu0 %v132_v17 }
 0xc6d   :  { %v2164_v18 = vpop.f32.mrf.mxu0 }
 0xc6e   :  { %v1562_v19 = vmin.f32 %v2164_v18, 0.0  ;;  %vm1560_vm8 = vcmp.gt.f32.partialorder %v2164_v18, 0.0 }
 0xc6f   :  { %v1550_v5 = vpop.f32.mrf.mxu0 }
 0xc70   :  { %v1565_v20 = vmul.f32 1.442695, %v1562_v19  ;;  %v1561_v22 = vmin.f32 %v1550_v5, 0.0  ;;  %vm1559_vm7 = vcmp.gt.f32.partialorder %v1550_v5, 0.0 }
 0xc72   :  { %2244 = vpow2.f32 %v1565_v20  ;;  %v1563_v24 = vmul.f32 1.442695, %v1561_v22 }
 0xc74   :  { %2246 = vpow2.f32 %v1563_v24 }
 0xc7f   :  { %v2245_v25 = vpop.eup %2244 }
 0xc80   :  { %v1938_v28 = vadd.f32 -1.0, %v2245_v25 }
 0xc81   :  { %v2247_v27 = vpop.eup %2246 }
 0xc82   :  { %v1937_v29 = vadd.f32 -1.0, %v2247_v27  ;;  %v1570_v8 = vsel %vm1560_vm8, %v2164_v18, %v1938_v28 }
 0xc84   :  { %v1569_v30 = vsel %vm1559_vm7, %v1550_v5, %v1937_v29 }
 0xc85   :  { %2173 = vmatprep.mubr.msk.f32.mxu0 %vm138_vm0, %v1569_v30 }
 0xc86   :  { %2174 = vmatmul.mubr.msk.f32.vlgmr.msra.gmra.mxu0 %vm138_vm0, %v1570_v8 }
 0xd46   :  { %v2175_v32 = vpop.f32.mrf.mxu0 }
 0xd47   :  { %v1653_v36 = vadd.f32 %v2175_v32, %v2615_v43 }
 0xd48   :  { %v1643_v37 = vpop.f32.mrf.mxu0 }
 0xd49   :  { %v1652_v10 = vadd.f32 %v1643_v37, %v2617_v16  ;;  %2177 = vmatpush3.xpose.msk.msra.mxu1 %vm138_vm0, %v1653_v36  ;;  %2183 = vmatprep.subr.mxu0 %v1653_v36  ;;  %v1661_v38 = vmul.f32 %v1941_v35, %v1653_v36 }
 0xd4a   :  { %2184 = vmatpush3.msra.mxu0 %v1653_v36  ;;  %2178 = vmatprep.subr.mxu1 %v2395_v6 }
 0xd4b   :  { %2185 = vmatprep.subr.mxu0 %v1652_v10  ;;  %v1665_v39 = vsel %vm138_vm0, %v1661_v38, 0.0  ;;  %v1660_v40 = vmul.f32 %v1941_v35, %v1652_v10 }
 0xd4c   :  { %1666 = vadd.xlane.f32.xlu1 %v1665_v39  ;;  %2186 = vmatpush3.msra.mxu0 %v1652_v10 }
 0xd4d   :  { %2179 = vmatpush3.xpose.msk.msra.mxu1 %vm138_vm0, %v1652_v10  ;;  %v1662_v41 = vsel %vm138_vm0, %v1660_v40, 0.0 }
 0xd4e   :  { %1663 = vadd.xlane.f32.xlu0 %v1662_v41 }
 0xd50   :  { %2181 = vmatmul.mubr.msk.f32.vlgmr.msra.gmra.mxu1 %vm138_vm0, %v137_v42 }
 0xdd5   :  { %v1667_v44 = vpop.xlane.xlu1 %1666 }
 0xdd7   :  { %v1664_v16 = vpop.xlane.xlu0 %1663 }
 0xe10   :  { %v1743_v43 = vpop.f32.mrf.mxu1 }
 0xe11   :  { %v1750_v6 = vrot.slane %v1743_v43, %v2484_v9 }
 0xe12   :  { %v2182_v45 = vpop.f32.mrf.mxu1 }
 0xe13   :  { %v1751_v46 = vadd.f32 %v1750_v6, %v1664_v16  ;;  %v1752_v47 = vadd.f32 %v1750_v6, %v1667_v44 }
 0xe15   :  { %vm1754_vm9 = vcmp.gt.f32.partialorder %v1752_v47, 0.0  ;;  %v1756_v48 = vmul.f32 0.01, %v1752_v47  ;;  %vm1753_vm10 = vcmp.gt.f32.partialorder %v1751_v46, 0.0  ;;  %v1755_v49 = vmul.f32 0.01, %v1751_v46 }
 0xe17   :  { %v1758_v50 = vsel %vm1754_vm9, %v1752_v47, %v1756_v48  ;;  %v1757_v51 = vsel %vm1753_vm10, %v1751_v46, %v1755_v49 }
 0xe18   :  { %v1760_v52 = vsel %vm101_vm6, %v1758_v50, -9e+15  ;;  %v1759_v21 = vsel %vm100_vm2, %v1757_v51, -9e+15 }
 0xe19   :  { %v1764_v33 = vsel %vm325_vm5, %v1760_v52, -inf  ;;  %v1761_v9 = vsel %vm325_vm5, %v1759_v21, -inf }
 0xe1a   :  { %1765 = vmax.xlane.f32.xlu1 %v1764_v33  ;;  %1762 = vmax.xlane.f32.xlu0 %v1761_v9 }
 0xea3   :  { %v1766_v53 = vpop.xlane.xlu1 %1765  ;;  %v1763_v23 = vpop.xlane.xlu0 %1762 }
 0xea4   :  { %v1768_v34 = vsub.f32 %v1760_v52, %v1766_v53  ;;  %v1767_v54 = vsub.f32 %v1759_v21, %v1763_v23 }
 0xea6   :  { %v1771_v55 = vmul.f32 1.442695, %v1768_v34  ;;  %v1769_v56 = vmul.f32 1.442695, %v1767_v54 }
 0xea8   :  { %2248 = vpow2.f32 %v1771_v55 }
 0xea9   :  { %2250 = vpow2.f32 %v1769_v56 }
 0xeb5   :  { %v2249_v57 = vpop.eup %2248 }
 0xeb6   :  { %v2251_v31 = vpop.eup %2250  ;;  %v1776_v58 = vsel %vm325_vm5, %v2249_v57, 0.0 }
 0xeb7   :  { %1777 = vadd.xlane.f32.xlu1 %v1776_v58  ;;  %v1773_v26 = vsel %vm325_vm5, %v2251_v31, 0.0 }
 0xeb8   :  { %1774 = vadd.xlane.f32.xlu0 %v1773_v26 }
 0xf40   :  { %v1778_v59 = vpop.xlane.xlu1 %1777 }
 0xf41   :  { %2252 = vrcp.f32 %v1778_v59  ;;  %v1775_v60 = vpop.xlane.xlu0 %1774 }
 0xf42   :  { %2254 = vrcp.f32 %v1775_v60 }
 0xf4e   :  { %v2253_v61 = vpop.eup %2252 }
 0xf4f   :  { %v2255_v62 = vpop.eup %2254  ;;  %v1782_v63 = vmul.f32 %v2253_v61, %v2249_v57 }
 0xf50   :  { %v1781_v0 = vmul.f32 %v2255_v62, %v2251_v31 }
 0xf52   :  { %2187 = vmatprep.mubr.msk.f32.mxu0 %vm325_vm5, %v1781_v0 }
 0xf53   :  { %2188 = vmatmul.mubr.msk.f32.vlgmr.msra.gmra.mxu0 %vm325_vm5, %v1782_v63 }
0x1013   :  { %v2189_v1 = vpop.f32.mrf.mxu0 }
0x1014   :  { %v1867_v3 = vmin.f32 %v2189_v1, 0.0  ;;  %vm1865_vm2 = vcmp.gt.f32.partialorder %v2189_v1, 0.0 }
0x1015   :  { %v1855_v4 = vpop.f32.mrf.mxu0 }
0x1016   :  { %v1870_v7 = vmul.f32 1.442695, %v1867_v3  ;;  %v1866_v11 = vmin.f32 %v1855_v4, 0.0  ;;  %vm1864_vm6 = vcmp.gt.f32.partialorder %v1855_v4, 0.0 }
0x1018   :  { %2256 = vpow2.f32 %v1870_v7  ;;  %v1868_v12 = vmul.f32 1.442695, %v1866_v11 }
0x101a   :  { %2258 = vpow2.f32 %v1868_v12 }
0x1025   :  { %v2257_v13 = vpop.eup %2256 }
0x1026   :  { %v1948_v14 = vadd.f32 -1.0, %v2257_v13 }
0x1027   :  { %v2259_v2 = vpop.eup %2258 }
0x1028   :  { %v1875_v15 = vsel %vm1865_vm2, %v2189_v1, %v1948_v14  ;;  %v1947_v17 = vadd.f32 -1.0, %v2259_v2 }
0x1029   :  { %1877 = vst.msk [vmem:[#allocation11 + $0x8] sm:$0xff] %vm138_vm0, %v1875_v15 }
0x102a   :  { %v1874_v18 = vsel %vm1864_vm6, %v1855_v4, %v1947_v17 }
0x102b   :  { %1876 = vst.msk [vmem:[#allocation11] sm:$0xff] %vm138_vm0, %v1874_v18 }
0x102c   :  { %2371 = shalt.err (!%p2368_p1)
}
0x102d   :  { %1889 = dma.vmem_to_hbm [thread:$0]  %s1884_s9, 256, %s2673_s8, [#allocation4], %s2390_s10, %s2390_s10, %s2391_s11  }
0x102e   :  { %2386 = dma.done.wait [#allocation4], 256  }
0x102f   :  { %2387 = vsyncadd [#allocation4], 4294967040 }
0x1030   :  { %1893 = vsyncpa [#allocation3], 1 }
0x1031   :  { %1894 = vsyncpa [#allocation6], 1 }
0x1032   :  { %1895 = vsyncpa [#allocation9], 1 }
0x1033   :  { %1896 = vsyncpa [#allocation4], 1 }

</bundles_post_ra>
